<compile_context>
chip_gen: v6e
topology: v6e:2x2x1
jax: 0.10.0
libtpu: 0.0.40
codegen_flags: <defaults>
</compile_context>

<pallas_src>
import functools

import numpy as np
import jax
import jax.numpy as jnp
from jax.experimental import pallas as pl
from jax.experimental.pallas import tpu as pltpu


def _round_up(x, mult):
    return (x + mult - 1) // mult * mult


# ---------------------------------------------------------------------------
# Pallas kernel: one (batch, time-tile) per grid step.
# Two wide matmuls, one lane-dense store. No in-kernel RMW, no tiny-N dots.
# ---------------------------------------------------------------------------
def _isac_dual_kernel(p_ref, wcat_ref, dcat_ref, o_ref):
    # p_ref    : (Lt, K)     im2col patches of the circularly padded signal
    # wcat_ref : (K, C2p)    [w_real^T | w_imag^T], channels zero-padded to 128
    # dcat_ref : (C2p, Kp)   [dec_real ; dec_imag], zero-padded to (128, 128k)
    # o_ref    : (Lt, Kp)    pre-overlap-add synthesis slab (K on lanes)
    coeff = jnp.dot(p_ref[...], wcat_ref[...],
                    preferred_element_type=jnp.float32)           # (Lt, C2p)
    o_ref[...] = jnp.dot(coeff, dcat_ref[...],
                         preferred_element_type=jnp.float32)      # (Lt, Kp)


# ---------------------------------------------------------------------------
# Wrapper
# ---------------------------------------------------------------------------
@functools.partial(jax.jit,
                   static_argnames=("stride", "kernel_max", "Ls", "time_tile"))
def isac_dual_forward(x, w_real, w_imag, dw_real, dw_imag, *,
                      stride, kernel_max, Ls, time_tile=512):
    x = x.astype(jnp.float32)
    B, L = x.shape
    C, K = w_real.shape
    d = stride
    assert K == kernel_max and K % d == 0
    m = K // d
    pad = K // 2
    assert L >= pad, "circular pad requires pad <= signal length"

    # circular padding (== F.pad(..., mode='circular')) -- glue
    xp = jnp.pad(x, ((0, 0), (pad, pad)), mode="wrap")            # (B, L + 2*pad)
    Lp = L + 2 * pad
    L_in = (Lp - K) // d + 1

    # time tiling over L_in (grid axis), padded rows are zeros and get dropped
    Lt = min(_round_up(L_in, 8), _round_up(max(time_tile, 8), 8))
    n_t = -(-L_in // Lt)
    L_in_pad = n_t * Lt

    # im2col -- glue (pure gather / layout)
    # TODO(synk): for long signals, move this im2col inside the kernel (build
    # the (Lt, K) patch block from the polyphase padded signal) to cut HBM read
    # traffic by K/stride x; kept in XLA here for lowering robustness.
    idx = jnp.arange(L_in)[:, None] * d + jnp.arange(K)[None, :]
    patches = xp[:, idx]                                          # (B, L_in, K)
    if L_in_pad != L_in:
        patches = jnp.pad(patches, ((0, 0), (0, L_in_pad - L_in), (0, 0)))

    # fused + lane-padded weights (single analysis matrix, single decoder matrix)
    C2 = 2 * C
    C2p = _round_up(C2, 128)
    Kp = _round_up(K, 128)
    wcat = jnp.zeros((K, C2p), jnp.float32)
    wcat = wcat.at[:, :C].set(w_real.T.astype(jnp.float32))
    wcat = wcat.at[:, C:C2].set(w_imag.T.astype(jnp.float32))
    dcat = jnp.zeros((C2p, Kp), jnp.float32)
    dcat = dcat.at[:C, :K].set(dw_real.astype(jnp.float32))
    dcat = dcat.at[C:C2, :K].set(dw_imag.astype(jnp.float32))

    slab = pl.pallas_call(
        _isac_dual_kernel,
        out_shape=jax.ShapeDtypeStruct((B, L_in_pad, Kp), jnp.float32),
        grid=(B, n_t),
        in_specs=[
            pl.BlockSpec((None, Lt, K), lambda b, t: (b, t, 0)),   # patches tile
            pl.BlockSpec((K, C2p), lambda b, t: (0, 0)),           # fused analysis W
            pl.BlockSpec((C2p, Kp), lambda b, t: (0, 0)),          # fused decoder W
        ],
        out_specs=pl.BlockSpec((None, Lt, Kp), lambda b, t: (b, t, 0)),
        compiler_params=pltpu.CompilerParams(
            dimension_semantics=("parallel", "parallel")),
    )(patches, wcat, dcat)

    # overlap-add (cheap XLA glue): y_full[(i+q)*d + r] += slab[i, q*d + r]
    slab = slab[:, :L_in, :K].reshape(B, L_in, m, d)
    rows = L_in + m - 1
    acc = jnp.zeros((B, rows, d), jnp.float32)
    for q in range(m):                      # m is small (K // stride)
        acc = acc.at[:, q:q + L_in, :].add(slab[:, :, q, :])
    y_full = acc.reshape(B, rows * d)                              # T = (L_in-1)*d + K
    T = rows * d

    # conv_transpose1d semantics: crop `padding`, extend to Ls (output_padding)
    output_padding = Ls - (L_in - 1) * d + 2 * pad - K
    assert 0 <= output_padding < d, "invalid output_padding for these shapes"
    if pad + Ls <= T:
        y = y_full[:, pad:pad + Ls]
    else:
        y = jnp.pad(y_full[:, pad:], ((0, 0), (0, pad + Ls - T)))
    return y


# ---------------------------------------------------------------------------
# Deterministic synthetic "audfilters" (init-time filter design, not forward
# compute): modulated Hann windows, complex valued.
# TODO(synk): the real audfilters() auditory-scale design is not reproduced;
# any (C, K) complex filter bank gives identical forward-pass semantics.
# ---------------------------------------------------------------------------
def make_synthetic_filters(num_channels, kernel_max):
    k = jnp.arange(kernel_max, dtype=jnp.float32)
    win = 0.5 - 0.5 * jnp.cos(2.0 * jnp.pi * (k + 0.5) / kernel_max)
    fcs = (jnp.arange(num_channels, dtype=jnp.float32) + 1.0) / (2.0 * num_channels)
    phase = 2.0 * jnp.pi * fcs[:, None] * (k[None, :] - kernel_max / 2.0)
    kr = (win[None, :] * jnp.cos(phase) / kernel_max).astype(jnp.float32)
    ki = (win[None, :] * jnp.sin(phase) / kernel_max).astype(jnp.float32)
    return kr, ki


# ---------------------------------------------------------------------------
# Pure-numpy reference mirroring the PyTorch forward (conv1d = cross-corr,
# conv_transpose1d = scatter-add), used only for validation.
# ---------------------------------------------------------------------------
def reference_forward(x, wr, wi, dwr, dwi, d, K, Ls):
    x = np.asarray(x, np.float64)
    wr, wi = np.asarray(wr, np.float64), np.asarray(wi, np.float64)
    dwr, dwi = np.asarray(dwr, np.float64), np.asarray(dwi, np.float64)
    B, L = x.shape
    pad = K // 2
    xp = np.concatenate([x[:, -pad:], x, x[:, :pad]], axis=1)
    L_in = (L + 2 * pad - K) // d + 1
    C = wr.shape[0]
    cr = np.zeros((B, C, L_in))
    ci = np.zeros((B, C, L_in))
    for i in range(L_in):
        seg = xp[:, i * d:i * d + K]
        cr[:, :, i] = seg @ wr.T
        ci[:, :, i] = seg @ wi.T
    T = (L_in - 1) * d + K
    yf = np.zeros((B, T))
    for i in range(L_in):
        yf[:, i * d:i * d + K] += cr[:, :, i] @ dwr + ci[:, :, i] @ dwi
    y = np.zeros((B, Ls))
    seg = yf[:, pad:pad + Ls]
    y[:, :seg.shape[1]] = seg
    return y


if __name__ == "__main__":
    # Small shapes consistent with the module's forward:
    #   B=2 signals of length L=64, C=8 filters of length kernel_max=16,
    #   stride d=4, Ls=64  ->  output_padding = 0.
    B, L = 2, 64
    num_channels, kernel_max, stride, Ls = 8, 16, 4, 64

    kr, ki = make_synthetic_filters(num_channels, kernel_max)
    # decoder params initialized to the analysis filters (as in __init__)
    dec_r, dec_i = kr, ki

    x = jax.random.normal(jax.random.PRNGKey(0), (B, L), dtype=jnp.float32)

    y = isac_dual_forward(x, kr, ki, dec_r, dec_i,
                          stride=stride, kernel_max=kernel_max, Ls=Ls)
    y = jax.block_until_ready(y)

    y_ref = reference_forward(np.asarray(x), np.asarray(kr), np.asarray(ki),
                              np.asarray(dec_r), np.asarray(dec_i),
                              stride, kernel_max, Ls)

    assert y.shape == (B, Ls), y.shape
    if not np.allclose(np.asarray(y), y_ref, rtol=5e-3, atol=5e-3):
        err = float(np.max(np.abs(np.asarray(y) - y_ref)))
        raise AssertionError(f"Pallas output does not match reference (max err {err})")

    print("KERNEL_OK")
</pallas_src>

<mosaic_0001>
module attributes {stable_mosaic.version = 11 : i64} {
  func.func @_isac_dual_kernel(%arg0: i32, %arg1: i32, %arg2: memref<1x24x16xf32, #tpu.memory_space<vmem>>, %arg3: memref<16x128xf32, #tpu.memory_space<vmem>>, %arg4: memref<128x128xf32, #tpu.memory_space<vmem>>, %arg5: memref<1x24x128xf32, #tpu.memory_space<vmem>>) attributes {dimension_semantics = [#tpu.dimension_semantics<parallel>, #tpu.dimension_semantics<parallel>], iteration_bounds = array<i64: 2, 1>, scalar_prefetch = 0 : i64, scratch_operands = 0 : i64, tpu.core_type = #tpu.core_type<tc>, window_params = [{transform_indices = @transform_0, window_bounds = array<i64: 1, 24, 16>}, {pipeline_mode = #tpu.pipeline_mode<synchronous>, transform_indices = @transform_1, window_bounds = array<i64: 16, 128>}, {pipeline_mode = #tpu.pipeline_mode<synchronous>, transform_indices = @transform_2, window_bounds = array<i64: 128, 128>}, {transform_indices = @transform_3, window_bounds = array<i64: 1, 24, 128>}]} {
    %c0 = arith.constant 0 : index
    %c0_0 = arith.constant 0 : index
    %c0_1 = arith.constant 0 : index
    %0 = vector.load %arg2[%c0, %c0_0, %c0_1] : memref<1x24x16xf32, #tpu.memory_space<vmem>>, vector<1x24x16xf32>
    %1 = vector.shape_cast %0 : vector<1x24x16xf32> to vector<24x16xf32>
    %c0_2 = arith.constant 0 : index
    %c0_3 = arith.constant 0 : index
    %2 = vector.load %arg3[%c0_2, %c0_3] : memref<16x128xf32, #tpu.memory_space<vmem>>, vector<16x128xf32>
    %cst = arith.constant dense<0.000000e+00> : vector<24x128xf32>
    %3 = tpu.matmul %1, %2, %cst {dimension_numbers = #tpu.dot_dimension_numbers<[1], [0], [0], [1], [0, 0, 1, 1], [], []>} : vector<24x16xf32>, vector<16x128xf32>, vector<24x128xf32> -> vector<24x128xf32>
    %c0_4 = arith.constant 0 : index
    %c0_5 = arith.constant 0 : index
    %4 = vector.load %arg4[%c0_4, %c0_5] : memref<128x128xf32, #tpu.memory_space<vmem>>, vector<128x128xf32>
    %cst_6 = arith.constant dense<0.000000e+00> : vector<24x128xf32>
    %5 = tpu.matmul %3, %4, %cst_6 {dimension_numbers = #tpu.dot_dimension_numbers<[1], [0], [0], [1], [0, 0, 1, 1], [], []>} : vector<24x128xf32>, vector<128x128xf32>, vector<24x128xf32> -> vector<24x128xf32>
    %c0_7 = arith.constant 0 : index
    %c0_8 = arith.constant 0 : index
    %c0_9 = arith.constant 0 : index
    %6 = vector.load %arg5[%c0_7, %c0_8, %c0_9] : memref<1x24x128xf32, #tpu.memory_space<vmem>>, vector<1x24x128xf32>
    %7 = vector.shape_cast %6 : vector<1x24x128xf32> to vector<24x128xf32>
    %8 = vector.shape_cast %5 : vector<24x128xf32> to vector<1x24x128xf32>
    tpu.vector_store %arg5[%c0_7, %c0_8, %c0_9], %8 {strides = array<i32>} : memref<1x24x128xf32, #tpu.memory_space<vmem>>, vector<1x24x128xf32>,
    return
  }
  func.func @transform_0(%arg0: i32, %arg1: i32) -> (i32, i32, i32) {
    %c0_i32 = arith.constant 0 : i32
    %c0_i32_0 = arith.constant 0 : i32
    return %arg0, %arg1, %c0_i32 : i32, i32, i32
  }
  func.func @transform_1(%arg0: i32, %arg1: i32) -> (i32, i32) {
    %c0_i32 = arith.constant 0 : i32
    %c0_i32_0 = arith.constant 0 : i32
    %c0_i32_1 = arith.constant 0 : i32
    return %c0_i32, %c0_i32_0 : i32, i32
  }
  func.func @transform_2(%arg0: i32, %arg1: i32) -> (i32, i32) {
    %c0_i32 = arith.constant 0 : i32
    %c0_i32_0 = arith.constant 0 : i32
    %c0_i32_1 = arith.constant 0 : i32
    return %c0_i32, %c0_i32_0 : i32, i32
  }
  func.func @transform_3(%arg0: i32, %arg1: i32) -> (i32, i32, i32) {
    %c0_i32 = arith.constant 0 : i32
    %c0_i32_0 = arith.constant 0 : i32
    return %arg0, %arg1, %c0_i32 : i32, i32, i32
  }
}

</mosaic_0001>

<bundles_post_ra>
// kernel: isac_dual_forward.1
= control target key start
LH: loop header
LB: loop body
LE: loop exit
PB: predicated region body
PF: predicated region fallthrough
CT: control target
= control target key end

     0   :  { %s686_s12 = smov 0   ;;  %s688_s13 = smov 0   ;;  %s829_s0 = inlined_call_operand.vmem [shape: f32[2,24,16], index: 0, kind: input, shape index: {}]   ;;  %s830_s1 = inlined_call_operand.vmem [shape: f32[16,128], index: 1, kind: input, shape index: {}]   ;;  %s831_s2 = inlined_call_operand.vmem [shape: f32[128,128], index: 2, kind: input, shape index: {}]   ;;  %s832_s3 = inlined_call_operand.vmem [shape: f32[2,24,128], index: 3, kind: output, shape index: {}]  }
   0x1   :  { %s690_s14 = smov 0  }
   0x2 LB: > { %s25_s15 = sadd.s32 1, %s658_s13  ;;  %p495_p0 = scmp.ge.s32.totalorder %s662_s14, 1  ;;  %s662_s14 = sphi %s690_s14, %s13_s14   ;;  %s658_s13 = sphi %s688_s13, %s834_s13   ;;  %s654_s12 = sphi %s686_s12, %s833_s12  }
   0x3   : > { %p27_p1 = scmp.ge.s32.totalorder %s25_s15, 2  ;;  %p158_p2 = scmp.lt.s32.totalorder %s662_s14, 3 }
   0x5   : > { %s836_s15 = smov (%p27_p1, %s25_s15), 0  ;;  %p159_p3 = pnand %p495_p0, %p158_p2 }
   0x6   : > { %p191_p4 = scmp.lt.s32.totalorder (!%p159_p3), %s654_s12, 1 }
   0x7   : > { %162 = sbr.rel (%p159_p3) target bundleno = 416 (0x1a0), region = 32 }
   0xc   : > { %v214_v0 = vld [vmem:[%s830_s1 + $0x8] sm:$0xff]  ;;  %v664_v1 = vmov 0.0   ;;  %v213_v2 = vld [vmem:[%s830_s1] sm:$0xff]  ;;  %vm665_vm0 = vmmov 0   ;;  %s838_s12 = smov (!%p191_p4, %s654_s12), 1  ;;  %v320_v3 = vld [vmem:[%s831_s2 + $0x78] sm:$0xff] }
   0xd   : > { %527 = vmatprep.subr.mxu0 %v664_v1  ;;  %531 = vmatprep.mubr.msk.f32.mxu0 %vm665_vm0, %v664_v1  ;;  %s613_s22 = smul.u32 24, %s838_s12  ;;  %v319_v4 = vld [vmem:[%s831_s2 + $0x70] sm:$0xff]  ;;  %vm215_vm1 = vcmask 130048   ;;  %v318_v5 = vld [vmem:[%s831_s2 + $0x68] sm:$0xff]  ;;  %v317_v8 = vld [vmem:[%s831_s2 + $0x60] sm:$0xff] }
   0xe   : > { %528 = vmatpush3.msra.mxu0 %v214_v0  ;;  %581 = vmatprep.subr.mxu1 %v664_v1  ;;  %v316_v10 = vld [vmem:[%s831_s2 + $0x58] sm:$0xff]  ;;  %v315_v11 = vld [vmem:[%s831_s2 + $0x50] sm:$0xff]  ;;  %v314_v12 = vld [vmem:[%s831_s2 + $0x48] sm:$0xff] }
   0xf   : > { %529 = vmatprep.subr.mxu0 %v664_v1  ;;  %597 = vmatpush3.msra.mxu1 %v320_v3  ;;  %s198_s27 = scalar_lea.vmem %s829_s0, %s613_s22  ;;  %v313_v13 = vld [vmem:[%s831_s2 + $0x40] sm:$0xff]  ;;  %v312_v14 = vld [vmem:[%s831_s2 + $0x38] sm:$0xff]  ;;  %v311_v15 = vld [vmem:[%s831_s2 + $0x30] sm:$0xff]  ;;  %s208_s9 = scalar_lea.vmem %s832_s3, %s613_s22 }
  0x10   : > { %530 = vmatpush3.msra.mxu0 %v213_v2  ;;  %582 = vmatprep.subr.mxu1 %v664_v1  ;;  %v210_v6 = vld [vmem:[%s198_s27] sm:$0xff]  ;;  %v211_v7 = vld [vmem:[%s198_s27 + $0x8] sm:$0xff]  ;;  %v212_v9 = vld [vmem:[%s198_s27 + $0x10] sm:$0xff] }
  0x11   : > { %540 = vmatprep.subr.mxu0 %v664_v1  ;;  %598 = vmatpush3.msra.mxu1 %v319_v4  ;;  %v310_v16 = vld [vmem:[%s831_s2 + $0x28] sm:$0xff]  ;;  %v309_v17 = vld [vmem:[%s831_s2 + $0x20] sm:$0xff]  ;;  %v308_v18 = vld [vmem:[%s831_s2 + $0x18] sm:$0xff] }
  0x12   : > { %583 = vmatprep.subr.mxu1 %v664_v1  ;;  %575 = vmatprep.mubr.msk.f32.mxu1 %vm665_vm0, %v664_v1  ;;  %v307_v19 = vld [vmem:[%s831_s2 + $0x10] sm:$0xff]  ;;  %v306_v20 = vld [vmem:[%s831_s2 + $0x8] sm:$0xff]  ;;  %v305_v21 = vld [vmem:[%s831_s2] sm:$0xff] }
  0x13   : > { %599 = vmatpush3.msra.mxu1 %v318_v5  ;;  %532 = vmatmul.mubr.msk.f32.vlgmr.msra.gmra.mxu0 %vm215_vm1, %v210_v6 }
  0x14   : > { %584 = vmatprep.subr.mxu1 %v664_v1  ;;  %534 = vmatprep.mubr.msk.f32.mxu0 %vm665_vm0, %v664_v1 }
  0x15   : > { %541 = vmatpush3.msra.mxu0 %v320_v3  ;;  %600 = vmatpush3.msra.mxu1 %v317_v8 }
  0x16   : > { %542 = vmatprep.subr.mxu0 %v664_v1  ;;  %585 = vmatprep.subr.mxu1 %v664_v1 }
  0x17   : > { %543 = vmatpush3.msra.mxu0 %v319_v4  ;;  %601 = vmatpush3.msra.mxu1 %v316_v10 }
  0x18   : > { %535 = vmatmul.mubr.msk.f32.gmra.mxu0 %vm215_vm1, %v211_v7  ;;  %544 = vmatprep.subr.mxu0 %v664_v1 }
  0x19   : > { %537 = vmatprep.mubr.msk.f32.mxu0 %vm665_vm0, %v664_v1  ;;  %545 = vmatpush3.msra.mxu0 %v318_v5 }
  0x1a   : > { %546 = vmatprep.subr.mxu0 %v664_v1  ;;  %586 = vmatprep.subr.mxu1 %v664_v1 }
  0x1b   : > { %547 = vmatpush3.msra.mxu0 %v317_v8  ;;  %602 = vmatpush3.msra.mxu1 %v315_v11 }
  0x1c   : > { %538 = vmatmul.mubr.msk.f32.gmra.mxu0 %vm215_vm1, %v212_v9  ;;  %548 = vmatprep.subr.mxu0 %v664_v1 }
  0x1d   : > { %549 = vmatpush3.msra.mxu0 %v316_v10  ;;  %587 = vmatprep.subr.mxu1 %v664_v1 }
  0x1e   : > { %550 = vmatprep.subr.mxu0 %v664_v1  ;;  %603 = vmatpush3.msra.mxu1 %v314_v12 }
  0x1f   : > { %551 = vmatpush3.msra.mxu0 %v315_v11  ;;  %588 = vmatprep.subr.mxu1 %v664_v1 }
  0x20   : > { %552 = vmatprep.subr.mxu0 %v664_v1  ;;  %604 = vmatpush3.msra.mxu1 %v313_v13 }
  0x21   : > { %553 = vmatpush3.msra.mxu0 %v314_v12  ;;  %589 = vmatprep.subr.mxu1 %v664_v1 }
  0x22   : > { %554 = vmatprep.subr.mxu0 %v664_v1  ;;  %605 = vmatpush3.msra.mxu1 %v312_v14 }
  0x23   : > { %555 = vmatpush3.msra.mxu0 %v313_v13  ;;  %590 = vmatprep.subr.mxu1 %v664_v1 }
  0x24   : > { %556 = vmatprep.subr.mxu0 %v664_v1  ;;  %606 = vmatpush3.msra.mxu1 %v311_v15 }
  0x25   : > { %557 = vmatpush3.msra.mxu0 %v312_v14  ;;  %591 = vmatprep.subr.mxu1 %v664_v1 }
  0x26   : > { %558 = vmatprep.subr.mxu0 %v664_v1  ;;  %607 = vmatpush3.msra.mxu1 %v310_v16 }
  0x27   : > { %559 = vmatpush3.msra.mxu0 %v311_v15  ;;  %592 = vmatprep.subr.mxu1 %v664_v1 }
  0x28   : > { %560 = vmatprep.subr.mxu0 %v664_v1  ;;  %608 = vmatpush3.msra.mxu1 %v309_v17 }
  0x29   : > { %561 = vmatpush3.msra.mxu0 %v310_v16  ;;  %593 = vmatprep.subr.mxu1 %v664_v1 }
  0x2a   : > { %562 = vmatprep.subr.mxu0 %v664_v1  ;;  %609 = vmatpush3.msra.mxu1 %v308_v18 }
  0x2b   : > { %563 = vmatpush3.msra.mxu0 %v309_v17  ;;  %594 = vmatprep.subr.mxu1 %v664_v1 }
  0x2c   : > { %564 = vmatprep.subr.mxu0 %v664_v1  ;;  %610 = vmatpush3.msra.mxu1 %v307_v19 }
  0x2d   : > { %565 = vmatpush3.msra.mxu0 %v308_v18  ;;  %572 = vmatprep.mubr.msk.f32.mxu0 %vm665_vm0, %v664_v1 }
  0x2e   : > { %566 = vmatprep.subr.mxu0 %v664_v1  ;;  %595 = vmatprep.subr.mxu1 %v664_v1 }
  0x2f   : > { %567 = vmatpush3.msra.mxu0 %v307_v19  ;;  %611 = vmatpush3.msra.mxu1 %v306_v20 }
  0x30   : > { %568 = vmatprep.subr.mxu0 %v664_v1  ;;  %596 = vmatprep.subr.mxu1 %v664_v1 }
  0x31   : > { %569 = vmatpush3.msra.mxu0 %v306_v20  ;;  %612 = vmatpush3.msra.mxu1 %v305_v21 }
  0x32   : > { %570 = vmatprep.subr.mxu0 %v664_v1 }
  0x33   : > { %571 = vmatpush3.msra.mxu0 %v305_v21 }
  0xd3   : > { %v291_v22 = vpop.f32.mrf.mxu0 }
  0xd4   : > { %573 = vmatmul.mubr.f32.vlgmr.msra.gmra.mxu0 %v291_v22 }
  0xd5   : > { %v533_v23 = vpop.f32.mrf.mxu0 }
  0xd8   : > { %v296_v24 = vpop.f32.mrf.mxu0 }
  0xd9   : > { %576 = vmatmul.mubr.f32.vlgmr.msra.gmra.mxu1 %v296_v24 }
  0xda   : > { %v536_v25 = vpop.f32.mrf.mxu0  ;;  %578 = vmatprep.mubr.msk.f32.mxu1 %vm665_vm0, %v664_v1 }
  0xdc   : > { %v301_v26 = vpop.f32.mrf.mxu0 }
  0xdd   : > { %579 = vmatmul.mubr.f32.gmra.mxu1 %v301_v26 }
  0xde   : > { %v539_v27 = vpop.f32.mrf.mxu0 }
 0x194   : > { %v387_v28 = vpop.f32.mrf.mxu0 }
 0x195   : > { %401 = vst [vmem:[%s208_s9] sm:$0xff] %v387_v28 }
 0x196   : > { %v574_v29 = vpop.f32.mrf.mxu0 }
 0x199   : > { %v392_v30 = vpop.f32.mrf.mxu1 }
 0x19a   : > { %402 = vst [vmem:[%s208_s9 + $0x8] sm:$0xff] %v392_v30 }
 0x19b   : > { %v577_v31 = vpop.f32.mrf.mxu1 }
 0x19d   : > { %v397_v32 = vpop.f32.mrf.mxu1 }
 0x19e   : > { %403 = vst [vmem:[%s208_s9 + $0x10] sm:$0xff] %v397_v32 }
 0x19f   : > { %v580_v33 = vpop.f32.mrf.mxu1 }
 0x1a0 PF: > { %s13_s14 = sadd.s32 1, %s662_s14   ;;  %s833_s12 = smov %s658_s13 }
 0x1a1   : > { %p10_p5 = scmp.ge.s32.totalorder %s13_s14, 4   ;;  %s834_s13 = smov %s836_s15 }
 0x1a3   :  { %12 = sbr.rel (!%p10_p5) target bundleno = 2 (0x2), region = 62 }

</bundles_post_ra>
